<compile_context>
chip_gen: v7x
topology: tpu7x:2x2x1
jax: 0.10.0
libtpu: 0.0.40
codegen_flags: <defaults>
</compile_context>

<pallas_src>
import jax
import jax.numpy as jnp
from jax.experimental import pallas as pl
from jax.experimental.pallas import tpu as pltpu

_LANE = 128
_SUBLANE = 8


def _round_up(n, m):
    return ((n + m - 1) // m) * m


def _cdiv(a, b):
    return (a + b - 1) // b


def _pad2(a, shape):
    return jnp.pad(a, ((0, shape[0] - a.shape[0]), (0, shape[1] - a.shape[1])))


def _mlp_packed_kernel(x_ref, w1_ref, b1_ref, w2_ref, b2_ref, w3_ref, b3_ref,
                       o_ref):
    """output_size == 1: emit a lane-dense (1, tb) row of sigmoid outputs."""
    x = x_ref[...].astype(jnp.bfloat16)                     # in-kernel cast
    # fc1 + ReLU (bf16 MXU inputs, f32 accumulation / f32 epilogue).
    h1 = jnp.dot(x, w1_ref[...], preferred_element_type=jnp.float32)
    h1 = jnp.maximum(h1 + b1_ref[...], 0.0)
    # fc2 + ReLU
    h2 = jnp.dot(h1.astype(jnp.bfloat16), w2_ref[...],
                 preferred_element_type=jnp.float32)
    h2 = jnp.maximum(h2 + b2_ref[...], 0.0)
    # fc3: transpose h2 (aligned (tb,128)->(128,tb) f32 transpose on the idle
    # XLU) so the single output column lands along lanes, then a sublane-padded
    # (8, h) @ (h, tb) matmul; only row 0 of w3 is non-zero.
    h2t = jnp.transpose(h2).astype(jnp.bfloat16)            # (h_pad, tb)
    z = jnp.dot(w3_ref[...], h2t, preferred_element_type=jnp.float32)  # (8, tb)
    z = z[0:1, :] + b3_ref[...]                             # (1, tb) + (1, 1)
    o_ref[...] = (1.0 / (1.0 + jnp.exp(-z))).astype(o_ref.dtype)


def _mlp_slab_kernel(x_ref, w1_ref, b1_ref, w2_ref, b2_ref, w3_ref, b3_ref,
                     o_ref):
    """General output_size: lane-dense (tb, o_pad) slab output."""
    x = x_ref[...].astype(jnp.bfloat16)
    h1 = jnp.dot(x, w1_ref[...], preferred_element_type=jnp.float32)
    h1 = jnp.maximum(h1 + b1_ref[...], 0.0)
    h2 = jnp.dot(h1.astype(jnp.bfloat16), w2_ref[...],
                 preferred_element_type=jnp.float32)
    h2 = jnp.maximum(h2 + b2_ref[...], 0.0)
    z = jnp.dot(h2.astype(jnp.bfloat16), w3_ref[...],
                preferred_element_type=jnp.float32) + b3_ref[...]
    o_ref[...] = (1.0 / (1.0 + jnp.exp(-z))).astype(o_ref.dtype)


def _jnp_forward(x, w1, b1, w2, b2, w3, b3):
    """Pure-jnp path with the same bf16-in / f32-accumulate numerics."""
    bf, f32 = jnp.bfloat16, jnp.float32
    h1 = jnp.maximum(jnp.dot(x.astype(bf), w1.astype(bf),
                             preferred_element_type=f32) + b1, 0.0)
    h2 = jnp.maximum(jnp.dot(h1.astype(bf), w2.astype(bf),
                             preferred_element_type=f32) + b2, 0.0)
    z = jnp.dot(h2.astype(bf), w3.astype(bf), preferred_element_type=f32) + b3
    return jax.nn.sigmoid(z)


def simple_nn_3layer_classification(x, w1, b1, w2, b2, w3, b3, *,
                                    block_batch=2048, min_pallas_batch=256):
    """Fused 3-layer MLP forward (ReLU, ReLU, Sigmoid)."""
    batch, in_features = x.shape
    hidden = w1.shape[1]
    out_features = w3.shape[1]

    # Small-batch fast path: launch + pad/slice fixed costs dominate there.
    if batch < min_pallas_batch:
        return _jnp_forward(x, w1, b1, w2, b2, w3, b3)

    h_pad = _round_up(hidden, _LANE)

    # Batch tile: multiple of 128 (packed out-block is (1, tb)); capped so the
    # 1-D "parallel" grid has >=2 steps whenever possible (v7x: 2 TensorCores).
    b_lane = _round_up(batch, _LANE)
    tb_cap = max(_LANE, _round_up(_cdiv(b_lane, 2), _LANE))
    tb = min(_round_up(max(block_batch, 1), _LANE), b_lane, tb_cap)
    b_pad = _round_up(batch, tb)
    grid = (b_pad // tb,)

    # Host-side prep: only the batch dim of x is zero-padded (no feature pad,
    # no dtype cast -> a single HBM pass over x inside the kernel). Weights are
    # tiny, zero-padded to lane multiples, and stay VMEM-resident.
    x_p = _pad2(x.astype(jnp.float32), (b_pad, in_features))
    w1_p = _pad2(w1, (in_features, h_pad)).astype(jnp.bfloat16)
    w2_p = _pad2(w2, (h_pad, h_pad)).astype(jnp.bfloat16)
    b1_p = _pad2(b1.reshape(1, -1), (1, h_pad)).astype(jnp.float32)
    b2_p = _pad2(b2.reshape(1, -1), (1, h_pad)).astype(jnp.float32)

    resident = lambda shape: pl.BlockSpec(shape, lambda i: (0, 0))
    x_spec = pl.BlockSpec((tb, in_features), lambda i: (i, 0))
    weight_bytes = (w1_p.size + w2_p.size) * 2 + (b1_p.size + b2_p.size) * 4

    if out_features == 1:
        # fc3 weights as an (8, h_pad) row block (rows 1..7 zero); bias (1, 1).
        w3_p = _pad2(w3.reshape(hidden, 1).T, (_SUBLANE, h_pad)).astype(jnp.bfloat16)
        b3_p = jnp.reshape(b3, (1, 1)).astype(jnp.float32)
        cost = pl.CostEstimate(
            flops=2 * b_pad * h_pad * (in_features + h_pad + _SUBLANE),
            transcendentals=b_pad,
            bytes_accessed=x_p.size * 4 + weight_bytes + w3_p.size * 2 + 4
                           + b_pad * 4)
        out_p = pl.pallas_call(
            _mlp_packed_kernel,
            out_shape=jax.ShapeDtypeStruct((1, b_pad), jnp.float32),
            grid=grid,
            in_specs=[
                x_spec,
                resident((in_features, h_pad)), resident((1, h_pad)),   # fc1
                resident((h_pad, h_pad)), resident((1, h_pad)),         # fc2
                resident((_SUBLANE, h_pad)), resident((1, 1)),          # fc3
            ],
            out_specs=pl.BlockSpec((1, tb), lambda i: (0, i)),  # packed lanes
            compiler_params=pltpu.CompilerParams(
                dimension_semantics=("parallel",)),
            cost_estimate=cost,
        )(x_p, w1_p, b1_p, w2_p, b2_p, w3_p, b3_p)
        return out_p[0, :batch].reshape(batch, 1)

    # General output width: lane-dense slab output.
    o_pad = _round_up(out_features, _LANE)
    w3_p = _pad2(w3, (h_pad, o_pad)).astype(jnp.bfloat16)
    b3_p = _pad2(b3.reshape(1, -1), (1, o_pad)).astype(jnp.float32)
    cost = pl.CostEstimate(
        flops=2 * b_pad * h_pad * (in_features + h_pad + o_pad),
        transcendentals=b_pad * o_pad,
        bytes_accessed=x_p.size * 4 + weight_bytes + w3_p.size * 2
                       + b3_p.size * 4 + b_pad * o_pad * 4)
    out_p = pl.pallas_call(
        _mlp_slab_kernel,
        out_shape=jax.ShapeDtypeStruct((b_pad, o_pad), jnp.float32),
        grid=grid,
        in_specs=[
            x_spec,
            resident((in_features, h_pad)), resident((1, h_pad)),
            resident((h_pad, h_pad)), resident((1, h_pad)),
            resident((h_pad, o_pad)), resident((1, o_pad)),
        ],
        out_specs=pl.BlockSpec((tb, o_pad), lambda i: (i, 0)),
        compiler_params=pltpu.CompilerParams(dimension_semantics=("parallel",)),
        cost_estimate=cost,
    )(x_p, w1_p, b1_p, w2_p, b2_p, w3_p, b3_p)
    return out_p[:batch, :out_features]


def init_params(key, input_size, hidden_size, output_size):
    """PyTorch-Linear-style U(-1/sqrt(fan_in), 1/sqrt(fan_in)) init, (in, out)."""
    ks = jax.random.split(key, 6)

    def linear(kw, kb, fan_in, fan_out):
        bound = 1.0 / jnp.sqrt(fan_in)
        w = jax.random.uniform(kw, (fan_in, fan_out), jnp.float32, -bound, bound)
        b = jax.random.uniform(kb, (1, fan_out), jnp.float32, -bound, bound)
        return w, b

    w1, b1 = linear(ks[0], ks[1], input_size, hidden_size)
    w2, b2 = linear(ks[2], ks[3], hidden_size, hidden_size)
    w3, b3 = linear(ks[4], ks[5], hidden_size, output_size)
    return w1, b1, w2, b2, w3, b3


if __name__ == "__main__":
    key = jax.random.PRNGKey(0)
    k_x, k_p = jax.random.split(key)

    # batch=500: not a multiple of 128 -> exercises batch padding, two grid
    # steps (tb=256, both v7x TensorCores), and the packed (output_size=1) path.
    batch = 500
    input_size = 32
    hidden_size = 100
    output_size = 1

    x = jax.random.normal(k_x, (batch, input_size), jnp.float32)
    w1, b1, w2, b2, w3, b3 = init_params(k_p, input_size, hidden_size, output_size)

    out = simple_nn_3layer_classification(x, w1, b1, w2, b2, w3, b3)
    out = jax.block_until_ready(out)
    assert out.shape == (batch, output_size), out.shape

    # Pure-JAX reference with the same bf16-input / f32-accumulate numerics.
    ref = _jnp_forward(x, w1, b1, w2, b2, w3, b3)
    max_err = jnp.max(jnp.abs(out - ref))
    assert jnp.allclose(out, ref, atol=5e-3, rtol=5e-3), (
        f"max abs err = {max_err}")

    print("KERNEL_OK")
</pallas_src>

<mosaic_0001>
module attributes {stable_mosaic.version = 11 : i64} {
  func.func @_mlp_packed_kernel(%arg0: i32, %arg1: memref<256x32xf32, #tpu.memory_space<vmem>>, %arg2: memref<32x128xbf16, #tpu.memory_space<vmem>>, %arg3: memref<1x128xf32, #tpu.memory_space<vmem>>, %arg4: memref<128x128xbf16, #tpu.memory_space<vmem>>, %arg5: memref<1x128xf32, #tpu.memory_space<vmem>>, %arg6: memref<8x128xbf16, #tpu.memory_space<vmem>>, %arg7: memref<1x1xf32, #tpu.memory_space<vmem>>, %arg8: memref<1x256xf32, #tpu.memory_space<vmem>>) attributes {dimension_semantics = [#tpu.dimension_semantics<parallel>], iteration_bounds = array<i64: 2>, scalar_prefetch = 0 : i64, scratch_operands = 0 : i64, tpu.core_type = #tpu.core_type<tc>, window_params = [{transform_indices = @transform_0, window_bounds = array<i64: 256, 32>}, {pipeline_mode = #tpu.pipeline_mode<synchronous>, transform_indices = @transform_1, window_bounds = array<i64: 32, 128>}, {pipeline_mode = #tpu.pipeline_mode<synchronous>, transform_indices = @transform_2, window_bounds = array<i64: 1, 128>}, {pipeline_mode = #tpu.pipeline_mode<synchronous>, transform_indices = @transform_3, window_bounds = array<i64: 128, 128>}, {pipeline_mode = #tpu.pipeline_mode<synchronous>, transform_indices = @transform_4, window_bounds = array<i64: 1, 128>}, {pipeline_mode = #tpu.pipeline_mode<synchronous>, transform_indices = @transform_5, window_bounds = array<i64: 8, 128>}, {pipeline_mode = #tpu.pipeline_mode<synchronous>, transform_indices = @transform_6, window_bounds = array<i64: 1, 1>}, {transform_indices = @transform_7, window_bounds = array<i64: 1, 256>}]} {
    %c0 = arith.constant 0 : index
    %c0_0 = arith.constant 0 : index
    %0 = vector.load %arg1[%c0, %c0_0] : memref<256x32xf32, #tpu.memory_space<vmem>>, vector<256x32xf32>
    %1 = arith.truncf %0 : vector<256x32xf32> to vector<256x32xbf16>
    %c0_1 = arith.constant 0 : index
    %c0_2 = arith.constant 0 : index
    %2 = vector.load %arg2[%c0_1, %c0_2] : memref<32x128xbf16, #tpu.memory_space<vmem>>, vector<32x128xbf16>
    %cst = arith.constant dense<0.000000e+00> : vector<256x128xf32>
    %3 = tpu.matmul %1, %2, %cst {dimension_numbers = #tpu.dot_dimension_numbers<[1], [0], [0], [1], [0, 0, 1, 1], [], []>} : vector<256x32xbf16>, vector<32x128xbf16>, vector<256x128xf32> -> vector<256x128xf32>
    %c0_3 = arith.constant 0 : index
    %c0_4 = arith.constant 0 : index
    %4 = vector.load %arg3[%c0_3, %c0_4] : memref<1x128xf32, #tpu.memory_space<vmem>>, vector<1x128xf32>
    %5 = vector.broadcast %4 : vector<1x128xf32> to vector<256x128xf32>
    %6 = arith.addf %3, %5 : vector<256x128xf32>
    %cst_5 = arith.constant 0.000000e+00 : f32
    %7 = vector.broadcast %cst_5 : f32 to vector<256x128xf32>
    %8 = arith.maximumf %6, %7 : vector<256x128xf32>
    %9 = arith.truncf %8 : vector<256x128xf32> to vector<256x128xbf16>
    %c0_6 = arith.constant 0 : index
    %c0_7 = arith.constant 0 : index
    %10 = vector.load %arg4[%c0_6, %c0_7] : memref<128x128xbf16, #tpu.memory_space<vmem>>, vector<128x128xbf16>
    %cst_8 = arith.constant dense<0.000000e+00> : vector<256x128xf32>
    %11 = tpu.matmul %9, %10, %cst_8 {dimension_numbers = #tpu.dot_dimension_numbers<[1], [0], [0], [1], [0, 0, 1, 1], [], []>} : vector<256x128xbf16>, vector<128x128xbf16>, vector<256x128xf32> -> vector<256x128xf32>
    %c0_9 = arith.constant 0 : index
    %c0_10 = arith.constant 0 : index
    %12 = vector.load %arg5[%c0_9, %c0_10] : memref<1x128xf32, #tpu.memory_space<vmem>>, vector<1x128xf32>
    %13 = vector.broadcast %12 : vector<1x128xf32> to vector<256x128xf32>
    %14 = arith.addf %11, %13 : vector<256x128xf32>
    %cst_11 = arith.constant 0.000000e+00 : f32
    %15 = vector.broadcast %cst_11 : f32 to vector<256x128xf32>
    %16 = arith.maximumf %14, %15 : vector<256x128xf32>
    %17 = tpu.transpose %16, [1, 0] : vector<256x128xf32> -> vector<128x256xf32>
    %18 = arith.truncf %17 : vector<128x256xf32> to vector<128x256xbf16>
    %c0_12 = arith.constant 0 : index
    %c0_13 = arith.constant 0 : index
    %19 = vector.load %arg6[%c0_12, %c0_13] : memref<8x128xbf16, #tpu.memory_space<vmem>>, vector<8x128xbf16>
    %cst_14 = arith.constant dense<0.000000e+00> : vector<8x256xf32>
    %20 = tpu.matmul %19, %18, %cst_14 {dimension_numbers = #tpu.dot_dimension_numbers<[1], [0], [0], [1], [0, 0, 1, 1], [], []>} : vector<8x128xbf16>, vector<128x256xbf16>, vector<8x256xf32> -> vector<8x256xf32>
    %21 = vector.extract_strided_slice %20 {offsets = [0, 0], sizes = [1, 256], strides = [1, 1]} : vector<8x256xf32> to vector<1x256xf32>
    %c0_15 = arith.constant 0 : index
    %c0_16 = arith.constant 0 : index
    %22 = vector.load %arg7[%c0_15, %c0_16] : memref<1x1xf32, #tpu.memory_space<vmem>>, vector<1x1xf32>
    %23 = vector.broadcast %22 : vector<1x1xf32> to vector<1x256xf32>
    %24 = arith.addf %21, %23 : vector<1x256xf32>
    %cst_17 = arith.constant 0.000000e+00 : f32
    %25 = vector.broadcast %cst_17 : f32 to vector<1x256xf32>
    %26 = arith.subf %25, %24 : vector<1x256xf32>
    %27 = math.exp %26 : vector<1x256xf32>
    %cst_18 = arith.constant 1.000000e+00 : f32
    %28 = vector.broadcast %cst_18 : f32 to vector<1x256xf32>
    %29 = arith.addf %28, %27 : vector<1x256xf32>
    %cst_19 = arith.constant 1.000000e+00 : f32
    %30 = vector.broadcast %cst_19 : f32 to vector<1x256xf32>
    %31 = arith.divf %30, %29 : vector<1x256xf32>
    %c0_20 = arith.constant 0 : index
    %c0_21 = arith.constant 0 : index
    %32 = vector.load %arg8[%c0_20, %c0_21] : memref<1x256xf32, #tpu.memory_space<vmem>>, vector<1x256xf32>
    tpu.vector_store %arg8[%c0_20, %c0_21], %31 {strides = array<i32>} : memref<1x256xf32, #tpu.memory_space<vmem>>, vector<1x256xf32>,
    return
  }
  func.func @transform_0(%arg0: i32) -> (i32, i32) {
    %c0_i32 = arith.constant 0 : i32
    %c0_i32_0 = arith.constant 0 : i32
    return %arg0, %c0_i32 : i32, i32
  }
  func.func @transform_1(%arg0: i32) -> (i32, i32) {
    %c0_i32 = arith.constant 0 : i32
    %c0_i32_0 = arith.constant 0 : i32
    %c0_i32_1 = arith.constant 0 : i32
    return %c0_i32, %c0_i32_0 : i32, i32
  }
  func.func @transform_2(%arg0: i32) -> (i32, i32) {
    %c0_i32 = arith.constant 0 : i32
    %c0_i32_0 = arith.constant 0 : i32
    %c0_i32_1 = arith.constant 0 : i32
    return %c0_i32, %c0_i32_0 : i32, i32
  }
  func.func @transform_3(%arg0: i32) -> (i32, i32) {
    %c0_i32 = arith.constant 0 : i32
    %c0_i32_0 = arith.constant 0 : i32
    %c0_i32_1 = arith.constant 0 : i32
    return %c0_i32, %c0_i32_0 : i32, i32
  }
  func.func @transform_4(%arg0: i32) -> (i32, i32) {
    %c0_i32 = arith.constant 0 : i32
    %c0_i32_0 = arith.constant 0 : i32
    %c0_i32_1 = arith.constant 0 : i32
    return %c0_i32, %c0_i32_0 : i32, i32
  }
  func.func @transform_5(%arg0: i32) -> (i32, i32) {
    %c0_i32 = arith.constant 0 : i32
    %c0_i32_0 = arith.constant 0 : i32
    %c0_i32_1 = arith.constant 0 : i32
    return %c0_i32, %c0_i32_0 : i32, i32
  }
  func.func @transform_6(%arg0: i32) -> (i32, i32) {
    %c0_i32 = arith.constant 0 : i32
    %c0_i32_0 = arith.constant 0 : i32
    %c0_i32_1 = arith.constant 0 : i32
    return %c0_i32, %c0_i32_0 : i32, i32
  }
  func.func @transform_7(%arg0: i32) -> (i32, i32) {
    %c0_i32 = arith.constant 0 : i32
    %c0_i32_0 = arith.constant 0 : i32
    return %c0_i32, %arg0 : i32, i32
  }
}

</mosaic_0001>

<bundles_post_ra>
// kernel: tpu_custom_call.1
= control target key start
LH: loop header
LB: loop body
LE: loop exit
PB: predicated region body
PF: predicated region fallthrough
CT: control target
= control target key end

     0   :  { %s1840_s0 = inlined_call_operand.vmem [shape: f32[512,32], index: 0, kind: input, shape index: {}]   ;;  %s1841_s1 = inlined_call_operand.vmem [shape: bf16[32,128], index: 1, kind: input, shape index: {}]   ;;  %s1842_s2 = inlined_call_operand.vmem [shape: f32[1,128], index: 2, kind: input, shape index: {}]   ;;  %s1843_s3 = inlined_call_operand.vmem [shape: bf16[128,128], index: 3, kind: input, shape index: {}]   ;;  %s1844_s4 = inlined_call_operand.vmem [shape: f32[1,128], index: 4, kind: input, shape index: {}]   ;;  %s1845_s5 = inlined_call_operand.vmem [shape: bf16[8,128], index: 5, kind: input, shape index: {}]   ;;  %s1846_s6 = inlined_call_operand.<no memory space> [shape: f32[1,1], index: 6, kind: input, shape index: {}]   ;;  %s1847_s7 = inlined_call_operand.hbm [shape: f32[1,512], index: 7, kind: output, shape index: {}]  }
   0x1   :  { %v12_v0 = vstv %s1846_s6 }
   0x2   :  { %13 = vst [vmem:[#allocation2] sm:$0x1] %v12_v0 }
   0x3   :  { %14 = vsyncpa [#allocation4], 0 }
   0x4   :  { %16 = vsyncpa [#allocation4 + $0x1], 0  ;;  %s1569_s26 = smov 0   ;;  %s1571_s27 = smov 0  }
   0x5   :  { %s1573_s28 = smov 0   ;;  %s1575_s29 = smov 0  }
   0x6 LB: > { %s1118_s6 = sadd.s32 4294967295, %s1521_s29   ;;  %s1119_s30 = sadd.s32 4294967294, %s1521_s29   ;;  %s1521_s29 = sphi %s1575_s29, %s1853_s29   ;;  %s1517_s28 = sphi %s1573_s28, %s1852_s28   ;;  %s1513_s27 = sphi %s1571_s27, %s1851_s27   ;;  %s1509_s26 = sphi %s1569_s26, %s1850_s26  }
   0x7   : > { %s1592_s8 = sadd.s32 1, %s1521_s29   ;;  %s181_s9 = sadd.s32 1, %s1517_s28 }
   0x8   : > { %s178_s10 = ssub.s32 %s1521_s29, %s1592_s8  ;;  %p191_p0 = scmp.ne.s32.totalorder %s1517_s28, %s1513_s27 }
   0x9   : > { %p179_p1 = scmp.eq.s32.totalorder %s178_s10, 0  ;;  %p192_p2 = scmp.eq.s32.totalorder %s1118_s6, 1 }
   0xa   : > { %p197_p3 = scmp.ne.s32.totalorder %s1513_s27, %s1509_s26  ;;  %p198_p4 = scmp.eq.s32.totalorder %s1119_s30, 1 }
   0xb   : > { %s1602_s11 = scalar_select %p179_p1, %s1517_s28, %s181_s9  }
   0xc   : > { %p1604_p5 = por %p192_p2, %p191_p0  ;;  %p1608_p6 = por %p198_p4, %p197_p3 }
   0xd   : > { %p1122_p7 = scmp.ge.s32.totalorder %s1521_s29, 1  ;;  %p243_p8 = scmp.lt.s32.totalorder %s1521_s29, 3 }
   0xf   : > { %p244_p9 = pnand %p1122_p7, %p243_p8 }
  0x10   : > { %v1441_v1 = vld [vmem:[%s1841_s1] sm:$0xff] (!%p244_p9)   ;;  %s1617_s16 = sshll.u32 (!%p244_p9), %s1118_s6, 5  ;;  %v1442_v2 = vld [vmem:[%s1841_s1 + $0x8] sm:$0xff] (!%p244_p9)   ;;  %v1445_v5 = vld [vmem:[%s1843_s3 + $0x10] sm:$0xff] (!%p244_p9)   ;;  %vm354_vm0 = vcmask (!%p244_p9), 261120   ;;  %s272_s15 = sand.u32 (!%p244_p9), 1, %s1513_s27  }
  0x11   : > { %247 = sbr.rel (%p244_p9) target bundleno = 965 (0x3c5), region = 48  ;;  %p276_p10 = scmp.lt.s32.totalorder (!%p244_p9), %s1617_s16, 63  ;;  %1202 = vmatprep.subr.bf16.mxu0 (!%p244_p9), %v1441_v1  ;;  %v1443_v3 = vld [vmem:[%s1843_s3] sm:$0xff] (!%p244_p9)   ;;  %v1444_v4 = vld [vmem:[%s1843_s3 + $0x8] sm:$0xff] (!%p244_p9)   ;;  %v1446_v15 = vld [vmem:[%s1843_s3 + $0x18] sm:$0xff] (!%p244_p9)  }
  0x12   : > { %1203 = vmatpush3.bf16.msra.mxu0 (!%p244_p9), %v1441_v1  ;;  %1238 = vmatprep.subr.bf16.mxu1 (!%p244_p9), %v1443_v3  ;;  %v1447_v20 = vld [vmem:[%s1843_s3 + $0x20] sm:$0xff] (!%p244_p9)   ;;  %v1448_v23 = vld [vmem:[%s1843_s3 + $0x28] sm:$0xff] (!%p244_p9)   ;;  %v1449_v57 = vld [vmem:[%s1843_s3 + $0x30] sm:$0xff] (!%p244_p9)   ;;  %s1123_s17 = sshll.u32 (!%p244_p9), %s272_s15, 1  ;;  %s1798_s22 = scalar_lea.hbm (!%p244_p9), %s1847_s7, %s1617_s16 }
  0x13   : > { %1204 = vmatprep.subr.bf16.mxu0 (!%p244_p9), %v1442_v2  ;;  %1239 = vmatpush3.bf16.msra.mxu1 (!%p244_p9), %v1443_v3  ;;  %v1450_v58 = vld [vmem:[%s1843_s3 + $0x38] sm:$0xff] (!%p244_p9)   ;;  %v1704_v59 = vld [vmem:[%s1842_s2] ss:$0 sm:$0xff] (!%p244_p9)  ;;  %s274_s18 = scalar_lea.vmem (!%p244_p9), [#allocation3], %s1123_s17  ;;  %s1046_s23 = scalar_lea.sflag (!%p244_p9), [#allocation4], %s272_s15 }
  0x14   : > { %1240 = vmatprep.subr.bf16.mxu1 (!%p244_p9), %v1444_v4  ;;  %s1060_s19 = sshll.u32 (!%p244_p9), %s274_s18, 4  ;;  %s1525_s25 = smov (!%p244_p9), [#allocation3]   ;;  %s1800_s19 = int_to_ptr.vmem [resolvable:$true] %s1060_s19 }
  0x15   : > { %s1463_s6 = sshll.u32 (!%p244_p9), %s1525_s25, 4  ;;  %s1464_s6 = int_to_ptr.vmem [resolvable:$false] %s1463_s6 }
  0x16   : > { %1205 = vmatpush3.bf16.msra.mxu0 (!%p244_p9), %v1442_v2  ;;  %p1466_p0 = scmp.lt.s32.totalorder (!%p244_p9), %s1800_s19, %s1464_s6 }
  0x17   : > { %1241 = vmatpush3.bf16.msra.mxu1 (!%p244_p9), %v1444_v4 }
  0x18   : > { %s277_s21 = scalar_select %p276_p10, %s1617_s16, 63  ;;  %1242 = vmatprep.subr.bf16.mxu1 %v1445_v5 }
  0x1a   : > { %s1125_s24 = sshll.u32 %s277_s21, 3 }
  0x1b   : > { %s1633_s30 = scalar_lea.vmem %s1840_s0, %s1125_s24  ;;  %1243 = vmatpush3.bf16.msra.mxu1 %v1445_v5  ;;  %s1459_s24 = scalar_lea.vmem %s1800_s19, 32 }
  0x1c   : > { %v283_v6 = vld [vmem:[%s1633_s30] sm:$0xff]  ;;  %v284_v7 = vld [vmem:[%s1633_s30 + $0x8] sm:$0xff]  ;;  %v285_v8 = vld [vmem:[%s1633_s30 + $0x10] sm:$0xff]  ;;  %1244 = vmatprep.subr.bf16.mxu1 %v1446_v15  ;;  %p1460_p11 = scmp.ne.s32.totalorder %s1800_s19, %s1459_s24 }
  0x1d   : > { %v315_v9 = vpack.c.bf16 %v284_v7, %v283_v6  ;;  %v286_v10 = vld [vmem:[%s1633_s30 + $0x18] sm:$0xff]  ;;  %v287_v11 = vld [vmem:[%s1633_s30 + $0x20] sm:$0xff]  ;;  %v288_v12 = vld [vmem:[%s1633_s30 + $0x28] sm:$0xff] }
  0x1e   : > { %v316_v13 = vpack.c.bf16 %v286_v10, %v285_v8  ;;  %v317_v14 = vpack.c.bf16 %v288_v12, %v287_v11  ;;  %v289_v16 = vld [vmem:[%s1633_s30 + $0x30] sm:$0xff]  ;;  %v290_v17 = vld [vmem:[%s1633_s30 + $0x38] sm:$0xff]  ;;  %v291_v18 = vld [vmem:[%s1633_s30 + $0x40] sm:$0xff]  ;;  %p1461_p12 = pnand %p1460_p11, %p1604_p5 }
  0x1f   : > { %1206 = vmatprep.mubr.msk.bf16.mxu0 %vm354_vm0, %v315_v9  ;;  %v292_v19 = vld [vmem:[%s1633_s30 + $0x48] sm:$0xff]  ;;  %v318_v21 = vpack.c.bf16 %v290_v17, %v289_v16  ;;  %1245 = vmatpush3.bf16.msra.mxu1 %v1446_v15  ;;  %v293_v24 = vld [vmem:[%s1633_s30 + $0x50] sm:$0xff]  ;;  %v294_v25 = vld [vmem:[%s1633_s30 + $0x58] sm:$0xff] }
  0x20   : > { %1207 = vmatmul.mubr.msk.bf16.vlgmr.msra.gmra.mrb[0].mxu0 %vm354_vm0, %v316_v13  ;;  %v319_v22 = vpack.c.bf16 %v292_v19, %v291_v18  ;;  %1246 = vmatprep.subr.bf16.mxu1 %v1447_v20  ;;  %v295_v26 = vld [vmem:[%s1633_s30 + $0x60] sm:$0xff]  ;;  %v296_v27 = vld [vmem:[%s1633_s30 + $0x68] sm:$0xff]  ;;  %v320_v28 = vpack.c.bf16 %v294_v25, %v293_v24  ;;  %v297_v30 = vld [vmem:[%s1633_s30 + $0x70] sm:$0xff]  ;;  %p1462_p13 = pneg %p1461_p12 }
  0x21   : > { %1210 = vmatprep.mubr.msk.bf16.mxu0 %vm354_vm0, %v317_v14  ;;  %v321_v29 = vpack.c.bf16 %v296_v27, %v295_v26  ;;  %v298_v31 = vld [vmem:[%s1633_s30 + $0x78] sm:$0xff]  ;;  %v299_v32 = vld [vmem:[%s1633_s30 + $0x80] sm:$0xff]  ;;  %v300_v33 = vld [vmem:[%s1633_s30 + $0x88] sm:$0xff] }
  0x22   : > { %v322_v34 = vpack.c.bf16 %v298_v31, %v297_v30  ;;  %v323_v35 = vpack.c.bf16 %v300_v33, %v299_v32  ;;  %v301_v36 = vld [vmem:[%s1633_s30 + $0x90] sm:$0xff]  ;;  %v302_v37 = vld [vmem:[%s1633_s30 + $0x98] sm:$0xff]  ;;  %v303_v38 = vld [vmem:[%s1633_s30 + $0xa0] sm:$0xff] }
  0x23   : > { %1247 = vmatpush3.bf16.msra.mxu1 %v1447_v20  ;;  %v304_v39 = vld [vmem:[%s1633_s30 + $0xa8] sm:$0xff]  ;;  %v324_v40 = vpack.c.bf16 %v302_v37, %v301_v36  ;;  %v305_v42 = vld [vmem:[%s1633_s30 + $0xb0] sm:$0xff]  ;;  %v306_v43 = vld [vmem:[%s1633_s30 + $0xb8] sm:$0xff] }
  0x24   : > { %1248 = vmatprep.subr.bf16.mxu1 %v1448_v23  ;;  %v325_v41 = vpack.c.bf16 %v304_v39, %v303_v38  ;;  %v307_v44 = vld [vmem:[%s1633_s30 + $0xc0] sm:$0xff]  ;;  %v308_v45 = vld [vmem:[%s1633_s30 + $0xc8] sm:$0xff]  ;;  %v326_v46 = vpack.c.bf16 %v306_v43, %v305_v42  ;;  %v309_v48 = vld [vmem:[%s1633_s30 + $0xd0] sm:$0xff] }
  0x25   : > { %v327_v47 = vpack.c.bf16 %v308_v45, %v307_v44  ;;  %v310_v49 = vld [vmem:[%s1633_s30 + $0xd8] sm:$0xff]  ;;  %v311_v50 = vld [vmem:[%s1633_s30 + $0xe0] sm:$0xff]  ;;  %v312_v51 = vld [vmem:[%s1633_s30 + $0xe8] sm:$0xff] }
  0x26   : > { %v328_v52 = vpack.c.bf16 %v310_v49, %v309_v48  ;;  %v329_v53 = vpack.c.bf16 %v312_v51, %v311_v50  ;;  %v313_v54 = vld [vmem:[%s1633_s30 + $0xf0] sm:$0xff]  ;;  %v314_v55 = vld [vmem:[%s1633_s30 + $0xf8] sm:$0xff]  ;;  %s1465_s30 = scalar_lea.vmem %s1464_s6, 64 }
  0x27   : > { %1249 = vmatpush3.bf16.msra.mxu1 %v1448_v23  ;;  %v330_v56 = vpack.c.bf16 %v314_v55, %v313_v54  ;;  %p1467_p1 = scmp.lt.s32.totalorder %s1465_s30, %s1459_s24 }
  0x28   : > { %1211 = vmatmul.mubr.msk.bf16.gmra.mrb[4].mxu0 %vm354_vm0, %v318_v21  ;;  %1250 = vmatprep.subr.bf16.mxu1 %v1449_v57 }
  0x29   : > { %1214 = vmatprep.mubr.msk.bf16.mxu0 %vm354_vm0, %v319_v22  ;;  %p1468_p2 = por %p1467_p1, %p1466_p0 }
  0x2b   : > { %1251 = vmatpush3.bf16.msra.mxu1 %v1449_v57  ;;  %p1469_p3 = pnand %p1468_p2, %p1462_p13 }
  0x2c   : > { %1252 = vmatprep.subr.bf16.mxu1 %v1450_v58 }
  0x2f   : > { %1253 = vmatpush3.bf16.msra.mxu1 %v1450_v58 }
  0x30   : > { %1215 = vmatmul.mubr.msk.bf16.gmra.mrb[8].mxu0 %vm354_vm0, %v320_v28 }
  0x31   : > { %1218 = vmatprep.mubr.msk.bf16.mxu0 %vm354_vm0, %v321_v29 }
  0x38   : > { %1219 = vmatmul.mubr.msk.bf16.gmra.mrb[12].mxu0 %vm354_vm0, %v322_v34 }
  0x39   : > { %1222 = vmatprep.mubr.msk.bf16.mxu0 %vm354_vm0, %v323_v35 }
  0x40   : > { %1223 = vmatmul.mubr.msk.bf16.gmra.mrb[16].mxu0 %vm354_vm0, %v324_v40 }
  0x41   : > { %1226 = vmatprep.mubr.msk.bf16.mxu0 %vm354_vm0, %v325_v41 }
  0x48   : > { %1227 = vmatmul.mubr.msk.bf16.gmra.mrb[20].mxu0 %vm354_vm0, %v326_v46 }
  0x49   : > { %1230 = vmatprep.mubr.msk.bf16.mxu0 %vm354_vm0, %v327_v47 }
  0x50   : > { %1231 = vmatmul.mubr.msk.bf16.gmra.mrb[24].mxu0 %vm354_vm0, %v328_v52 }
  0x51   : > { %1234 = vmatprep.mubr.msk.bf16.mxu0 %vm354_vm0, %v329_v53 }
  0x58   : > { %1235 = vmatmul.mubr.msk.bf16.gmra.mrb[28].mxu0 %vm354_vm0, %v330_v56 }
  0xf3   : > { %v1208_v60 = vpop.f32.mrb[0].mxu0 }
  0xf4   : > { %v446_v61 = vadd.f32 %v1208_v60, %v1704_v59  ;;  %v437_v62 = vpop.f32.mrb[1].mxu0 }
  0xf5   : > { %v438_v63 = vadd.f32 %v1704_v59, %v437_v62  ;;  %v1209_v0 = vpop.f32.mrb[2].mxu0 }
  0xf6   : > { %v449_v1 = vadd.f32 %v1209_v0, %v1704_v59  ;;  %v440_v2 = vpop.f32.mrb[3].mxu0  ;;  %v566_v4 = vmax.f32 %v446_v61, 0.0 }
  0xf7   : > { %v441_v3 = vadd.f32 %v1704_v59, %v440_v2  ;;  %v564_v6 = vmax.f32 %v438_v63, 0.0 }
  0xf8   : > { %v567_v5 = vmax.f32 %v449_v1, 0.0 }
  0xf9   : > { %v565_v7 = vmax.f32 %v441_v3, 0.0 }
  0xfa   : > { %v597_v8 = vpack.c.bf16 %v567_v5, %v566_v4 }
  0xfb   : > { %v1212_v9 = vpop.f32.mrb[4].mxu0  ;;  %v596_v10 = vpack.c.bf16 %v565_v7, %v564_v6 }
  0xfc   : > { %v462_v11 = vadd.f32 %v1212_v9, %v1704_v59  ;;  %v453_v12 = vpop.f32.mrb[5].mxu0 }
  0xfd   : > { %v454_v13 = vadd.f32 %v1704_v59, %v453_v12  ;;  %v1213_v14 = vpop.f32.mrb[6].mxu0  ;;  %1254 = vmatprep.mubr.bf16.mxu1 %v596_v10 }
  0xfe   : > { %v465_v15 = vadd.f32 %v1213_v14, %v1704_v59  ;;  %v456_v16 = vpop.f32.mrb[7].mxu0  ;;  %1255 = vmatmul.mubr.bf16.vlgmr.msra.gmra.mrb[0].mxu1 %v597_v8  ;;  %v570_v18 = vmax.f32 %v462_v11, 0.0 }
  0xff   : > { %v457_v17 = vadd.f32 %v1704_v59, %v456_v16  ;;  %v568_v20 = vmax.f32 %v454_v13, 0.0 }
 0x100   : > { %v571_v19 = vmax.f32 %v465_v15, 0.0 }
 0x101   : > { %v569_v21 = vmax.f32 %v457_v17, 0.0 }
 0x102   : > { %v599_v22 = vpack.c.bf16 %v571_v19, %v570_v18 }
 0x103   : > { %v598_v23 = vpack.c.bf16 %v569_v21, %v568_v20  ;;  %v1216_v24 = vpop.f32.mrb[8].mxu0 }
 0x104   : > { %v478_v25 = vadd.f32 %v1216_v24, %v1704_v59  ;;  %v469_v26 = vpop.f32.mrb[9].mxu0 }
 0x105   : > { %v470_v27 = vadd.f32 %v1704_v59, %v469_v26  ;;  %v1217_v28 = vpop.f32.mrb[10].mxu0  ;;  %1258 = vmatprep.mubr.bf16.mxu1 %v598_v23 }
 0x106   : > { %v481_v29 = vadd.f32 %v1217_v28, %v1704_v59  ;;  %v472_v30 = vpop.f32.mrb[11].mxu0  ;;  %1259 = vmatmul.mubr.bf16.gmra.mrb[4].mxu1 %v599_v22  ;;  %v574_v32 = vmax.f32 %v478_v25, 0.0 }
 0x107   : > { %v473_v31 = vadd.f32 %v1704_v59, %v472_v30  ;;  %v572_v34 = vmax.f32 %v470_v27, 0.0 }
 0x108   : > { %v575_v33 = vmax.f32 %v481_v29, 0.0 }
 0x109   : > { %v573_v35 = vmax.f32 %v473_v31, 0.0 }
 0x10a   : > { %v601_v36 = vpack.c.bf16 %v575_v33, %v574_v32 }
 0x10b   : > { %v600_v37 = vpack.c.bf16 %v573_v35, %v572_v34  ;;  %v1220_v38 = vpop.f32.mrb[12].mxu0 }
 0x10c   : > { %v494_v39 = vadd.f32 %v1220_v38, %v1704_v59  ;;  %v485_v40 = vpop.f32.mrb[13].mxu0 }
 0x10d   : > { %v486_v41 = vadd.f32 %v1704_v59, %v485_v40  ;;  %v1221_v42 = vpop.f32.mrb[14].mxu0  ;;  %1262 = vmatprep.mubr.bf16.mxu1 %v600_v37 }
 0x10e   : > { %v497_v43 = vadd.f32 %v1221_v42, %v1704_v59  ;;  %v488_v44 = vpop.f32.mrb[15].mxu0  ;;  %1263 = vmatmul.mubr.bf16.gmra.mrb[8].mxu1 %v601_v36  ;;  %v578_v46 = vmax.f32 %v494_v39, 0.0 }
 0x10f   : > { %v489_v45 = vadd.f32 %v1704_v59, %v488_v44  ;;  %v576_v48 = vmax.f32 %v486_v41, 0.0 }
 0x110   : > { %v579_v47 = vmax.f32 %v497_v43, 0.0 }
 0x111   : > { %v577_v49 = vmax.f32 %v489_v45, 0.0 }
 0x112   : > { %v603_v50 = vpack.c.bf16 %v579_v47, %v578_v46 }
 0x113   : > { %v602_v51 = vpack.c.bf16 %v577_v49, %v576_v48  ;;  %v1224_v52 = vpop.f32.mrb[16].mxu0 }
 0x114   : > { %v510_v53 = vadd.f32 %v1224_v52, %v1704_v59  ;;  %v501_v54 = vpop.f32.mrb[17].mxu0 }
 0x115   : > { %v502_v55 = vadd.f32 %v1704_v59, %v501_v54  ;;  %v1225_v56 = vpop.f32.mrb[18].mxu0  ;;  %1266 = vmatprep.mubr.bf16.mxu1 %v602_v51 }
 0x116   : > { %v513_v57 = vadd.f32 %v1225_v56, %v1704_v59  ;;  %v504_v58 = vpop.f32.mrb[19].mxu0  ;;  %1267 = vmatmul.mubr.bf16.gmra.mrb[12].mxu1 %v603_v50  ;;  %v582_v61 = vmax.f32 %v510_v53, 0.0 }
 0x117   : > { %v505_v60 = vadd.f32 %v1704_v59, %v504_v58  ;;  %v580_v63 = vmax.f32 %v502_v55, 0.0 }
 0x118   : > { %v583_v62 = vmax.f32 %v513_v57, 0.0 }
 0x119   : > { %v581_v0 = vmax.f32 %v505_v60, 0.0 }
 0x11a   : > { %v605_v1 = vpack.c.bf16 %v583_v62, %v582_v61  ;;  %v1751_v61 = vld [vmem:[%s1844_s4] ss:$0 sm:$0xff] }
 0x11b   : > { %v604_v2 = vpack.c.bf16 %v581_v0, %v580_v63  ;;  %v1228_v3 = vpop.f32.mrb[20].mxu0 }
 0x11c   : > { %v526_v4 = vadd.f32 %v1228_v3, %v1704_v59  ;;  %v517_v5 = vpop.f32.mrb[21].mxu0 }
 0x11d   : > { %v518_v6 = vadd.f32 %v1704_v59, %v517_v5  ;;  %v1229_v7 = vpop.f32.mrb[22].mxu0  ;;  %1270 = vmatprep.mubr.bf16.mxu1 %v604_v2 }
 0x11e   : > { %v586_v8 = vmax.f32 %v526_v4, 0.0  ;;  %v529_v9 = vadd.f32 %v1229_v7, %v1704_v59  ;;  %v520_v10 = vpop.f32.mrb[23].mxu0  ;;  %1271 = vmatmul.mubr.bf16.gmra.mrb[16].mxu1 %v605_v1 }
 0x11f   : > { %v584_v11 = vmax.f32 %v518_v6, 0.0  ;;  %v521_v12 = vadd.f32 %v1704_v59, %v520_v10 }
 0x120   : > { %v587_v13 = vmax.f32 %v529_v9, 0.0 }
 0x121   : > { %v585_v14 = vmax.f32 %v521_v12, 0.0 }
 0x122   : > { %v607_v15 = vpack.c.bf16 %v587_v13, %v586_v8 }
 0x123   : > { %v606_v16 = vpack.c.bf16 %v585_v14, %v584_v11  ;;  %v1232_v17 = vpop.f32.mrb[24].mxu0 }
 0x124   : > { %v542_v18 = vadd.f32 %v1232_v17, %v1704_v59  ;;  %v533_v19 = vpop.f32.mrb[25].mxu0 }
 0x125   : > { %v534_v20 = vadd.f32 %v1704_v59, %v533_v19  ;;  %v1233_v21 = vpop.f32.mrb[26].mxu0  ;;  %1274 = vmatprep.mubr.bf16.mxu1 %v606_v16 }
 0x126   : > { %v590_v22 = vmax.f32 %v542_v18, 0.0  ;;  %v545_v23 = vadd.f32 %v1233_v21, %v1704_v59  ;;  %v536_v24 = vpop.f32.mrb[27].mxu0  ;;  %1275 = vmatmul.mubr.bf16.gmra.mrb[20].mxu1 %v607_v15 }
 0x127   : > { %v588_v25 = vmax.f32 %v534_v20, 0.0  ;;  %v537_v26 = vadd.f32 %v1704_v59, %v536_v24 }
 0x128   : > { %v591_v27 = vmax.f32 %v545_v23, 0.0 }
 0x129   : > { %v589_v28 = vmax.f32 %v537_v26, 0.0 }
 0x12a   : > { %v609_v29 = vpack.c.bf16 %v591_v27, %v590_v22 }
 0x12b   : > { %v608_v30 = vpack.c.bf16 %v589_v28, %v588_v25  ;;  %v1236_v31 = vpop.f32.mrb[28].mxu0 }
 0x12c   : > { %v558_v32 = vadd.f32 %v1236_v31, %v1704_v59  ;;  %v549_v33 = vpop.f32.mrb[29].mxu0 }
 0x12d   : > { %v550_v34 = vadd.f32 %v1704_v59, %v549_v33  ;;  %v1237_v35 = vpop.f32.mrb[30].mxu0  ;;  %1278 = vmatprep.mubr.bf16.mxu1 %v608_v30 }
 0x12e   : > { %v594_v36 = vmax.f32 %v558_v32, 0.0  ;;  %v561_v37 = vadd.f32 %v1237_v35, %v1704_v59  ;;  %v552_v38 = vpop.f32.mrb[31].mxu0  ;;  %1279 = vmatmul.mubr.bf16.gmra.mrb[24].mxu1 %v609_v29 }
 0x12f   : > { %v592_v39 = vmax.f32 %v550_v34, 0.0  ;;  %v553_v40 = vadd.f32 %v1704_v59, %v552_v38 }
 0x130   : > { %v595_v41 = vmax.f32 %v561_v37, 0.0 }
 0x131   : > { %v593_v42 = vmax.f32 %v553_v40, 0.0 }
 0x132   : > { %v611_v43 = vpack.c.bf16 %v595_v41, %v594_v36 }
 0x133   : > { %v610_v44 = vpack.c.bf16 %v593_v42, %v592_v39 }
 0x135   : > { %1282 = vmatprep.mubr.bf16.mxu1 %v610_v44 }
 0x136   : > { %1283 = vmatmul.mubr.bf16.gmra.mrb[28].mxu1 %v611_v43 }
 0x1d1   : > { %v1256_v45 = vpop.f32.mrb[0].mxu1 }
 0x1d2   : > { %v717_v46 = vpop.f32.mrb[1].mxu1  ;;  %v726_v62 = vadd.f32 %v1256_v45, %v1751_v61 }
 0x1d3   : > { %v1257_v47 = vpop.f32.mrb[2].mxu1  ;;  %v718_v63 = vadd.f32 %v1751_v61, %v717_v46 }
 0x1d4   : > { %v720_v48 = vpop.f32.mrb[3].mxu1  ;;  %v729_v1 = vadd.f32 %v1257_v47, %v1751_v61  ;;  %v846_v7 = vmax.f32 %v726_v62, 0.0 }
 0x1d5   : > { %v721_v4 = vadd.f32 %v1751_v61, %v720_v48  ;;  %v844_v11 = vmax.f32 %v718_v63, 0.0 }
 0x1d6   : > { %v847_v14 = vmax.f32 %v729_v1, 0.0 }
 0x1d7   : > { %v845_v17 = vmax.f32 %v721_v4, 0.0 }
 0x1d9   : > { %v1260_v49 = vpop.f32.mrb[4].mxu1 }
 0x1da   : > { %v733_v50 = vpop.f32.mrb[5].mxu1  ;;  %v742_v20 = vadd.f32 %v1260_v49, %v1751_v61 }
 0x1db   : > { %v1261_v51 = vpop.f32.mrb[6].mxu1  ;;  %v734_v22 = vadd.f32 %v1751_v61, %v733_v50 }
 0x1dc   : > { %v736_v52 = vpop.f32.mrb[7].mxu1  ;;  %v745_v25 = vadd.f32 %v1261_v51, %v1751_v61  ;;  %v850_v31 = vmax.f32 %v742_v20, 0.0 }
 0x1dd   : > { %v737_v28 = vadd.f32 %v1751_v61, %v736_v52  ;;  %v848_v35 = vmax.f32 %v734_v22, 0.0 }
 0x1de   : > { %v851_v38 = vmax.f32 %v745_v25, 0.0 }
 0x1df   : > { %v849_v41 = vmax.f32 %v737_v28, 0.0 }
 0x1e1   : > { %v1264_v53 = vpop.f32.mrb[8].mxu1 }
 0x1e2   : > { %v749_v54 = vpop.f32.mrb[9].mxu1  ;;  %v758_v44 = vadd.f32 %v1264_v53, %v1751_v61 }
 0x1e3   : > { %v1265_v55 = vpop.f32.mrb[10].mxu1  ;;  %v750_v46 = vadd.f32 %v1751_v61, %v749_v54 }
 0x1e4   : > { %v1738_v56 = vpop.f32.mrb[11].mxu1  ;;  %v761_v49 = vadd.f32 %v1265_v55, %v1751_v61 }
 0x1e5   : > { %v753_v52 = vadd.f32 %v1751_v61, %v1738_v56  ;;  %v852_v54 = vmax.f32 %v750_v46, 0.0 }
 0x1e6   : > { %v855_v55 = vmax.f32 %v761_v49, 0.0 }
 0x1e9   : > { %v1740_v59 = vpop.f32.mrb[12].mxu1 }
 0x1ea   : > { %v1742_v57 = vpop.f32.mrb[13].mxu1  ;;  %v774_v56 = vadd.f32 %v1740_v59, %v1751_v61 }
 0x1eb   : > { %v1744_v58 = vpop.f32.mrb[14].mxu1 }
 0x1ec   : > { %v1746_v60 = vpop.f32.mrb[15].mxu1  ;;  %v858_v59 = vmax.f32 %v774_v56, 0.0 }
 0x1f1   : > { %v1272_v0 = vpop.f32.mrb[16].mxu1 }
 0x1f2   : > { %v790_v2 = vadd.f32 %v1272_v0, %v1751_v61  ;;  %v781_v3 = vpop.f32.mrb[17].mxu1  ;;  %v854_v0 = vmax.f32 %v758_v44, 0.0 }
 0x1f3   : > { %v782_v5 = vadd.f32 %v1751_v61, %v781_v3  ;;  %v1273_v6 = vpop.f32.mrb[18].mxu1 }
 0x1f4   : > { %v862_v8 = vmax.f32 %v790_v2, 0.0  ;;  %v793_v9 = vadd.f32 %v1273_v6, %v1751_v61  ;;  %v784_v10 = vpop.f32.mrb[19].mxu1 }
 0x1f5   : > { %v860_v12 = vmax.f32 %v782_v5, 0.0  ;;  %v785_v13 = vadd.f32 %v1751_v61, %v784_v10 }
 0x1f6   : > { %v863_v15 = vmax.f32 %v793_v9, 0.0  ;;  %v1331_v16 = vpack.i.bf16 %v846_v7, %v862_v8  ;;  %v853_v7 = vmax.f32 %v753_v52, 0.0 }
 0x1f7   : > { %v861_v18 = vmax.f32 %v785_v13, 0.0  ;;  %v1327_v19 = vpack.i.bf16 %v844_v11, %v860_v12  ;;  %v766_v11 = vadd.f32 %v1751_v61, %v1742_v57 }
 0x1f8   : > { %v1333_v21 = vpack.i.bf16 %v847_v14, %v863_v15  ;;  %v777_v14 = vadd.f32 %v1744_v58, %v1751_v61 }
 0x1f9   : > { %v1276_v23 = vpop.f32.mrb[20].mxu1  ;;  %1328 = vxpose.xlu0.b32.start [1/16] %v1327_v19, 128  ;;  %v1329_v24 = vpack.i.bf16 %v845_v17, %v861_v18  ;;  %v769_v17 = vadd.f32 %v1751_v61, %v1746_v60  ;;  %v856_v22 = vmax.f32 %v766_v11, 0.0 }
 0x1fa   : > { %v806_v26 = vadd.f32 %v1276_v23, %v1751_v61  ;;  %v797_v27 = vpop.f32.mrb[21].mxu1  ;;  %v859_v58 = vmax.f32 %v777_v14, 0.0 }
 0x1fb   : > { %v798_v29 = vadd.f32 %v1751_v61, %v797_v27  ;;  %v1277_v30 = vpop.f32.mrb[22].mxu1  ;;  %v857_v27 = vmax.f32 %v769_v17, 0.0 }
 0x1fc   : > { %v866_v32 = vmax.f32 %v806_v26, 0.0  ;;  %v809_v33 = vadd.f32 %v1277_v30, %v1751_v61  ;;  %v800_v34 = vpop.f32.mrb[23].mxu1 }
 0x1fd   : > { %v864_v36 = vmax.f32 %v798_v29, 0.0  ;;  %v801_v37 = vadd.f32 %v1751_v61, %v800_v34  ;;  %1330 = vxpose.xlu0.b32.cont [2/16] %v1329_v24, 128 }
 0x1fe   : > { %v867_v39 = vmax.f32 %v809_v33, 0.0  ;;  %v1339_v40 = vpack.i.bf16 %v850_v31, %v866_v32  ;;  %v998_v31 = vld [vmem:[#allocation2] sm:$0x1] }
 0x1ff   : > { %v865_v42 = vmax.f32 %v801_v37, 0.0  ;;  %v1335_v43 = vpack.i.bf16 %v848_v35, %v864_v36 }
 0x200   : > { %v1341_v45 = vpack.i.bf16 %v851_v38, %v867_v39 }
 0x201   : > { %v1280_v47 = vpop.f32.mrb[24].mxu1  ;;  %1332 = vxpose.xlu0.b32.cont [3/16] %v1331_v16, 128  ;;  %v1337_v48 = vpack.i.bf16 %v849_v41, %v865_v42 }
 0x202   : > { %v822_v50 = vadd.f32 %v1280_v47, %v1751_v61  ;;  %v813_v51 = vpop.f32.mrb[25].mxu1 }
 0x203   : > { %v814_v62 = vadd.f32 %v1751_v61, %v813_v51  ;;  %v1281_v63 = vpop.f32.mrb[26].mxu1 }
 0x204   : > { %v870_v1 = vmax.f32 %v822_v50, 0.0  ;;  %v825_v53 = vadd.f32 %v1281_v63, %v1751_v61  ;;  %v816_v2 = vpop.f32.mrb[27].mxu1 }
 0x205   : > { %v868_v3 = vmax.f32 %v814_v62, 0.0  ;;  %v817_v4 = vadd.f32 %v1751_v61, %v816_v2  ;;  %1334 = vxpose.xlu0.b32.cont [4/16] %v1333_v21, 128 }
 0x206   : > { %v871_v5 = vmax.f32 %v825_v53, 0.0  ;;  %v1347_v6 = vpack.i.bf16 %v854_v0, %v870_v1 }
 0x207   : > { %v869_v8 = vmax.f32 %v817_v4, 0.0  ;;  %v1343_v9 = vpack.i.bf16 %v852_v54, %v868_v3 }
 0x208   : > { %v1349_v10 = vpack.i.bf16 %v855_v55, %v871_v5 }
 0x209   : > { %v1284_v12 = vpop.f32.mrb[28].mxu1  ;;  %1336 = vxpose.xlu0.b32.cont [5/16] %v1335_v43, 128  ;;  %v1345_v13 = vpack.i.bf16 %v853_v7, %v869_v8 }
 0x20a   : > { %v838_v15 = vadd.f32 %v1284_v12, %v1751_v61  ;;  %v829_v16 = vpop.f32.mrb[29].mxu1 }
 0x20b   : > { %v830_v18 = vadd.f32 %v1751_v61, %v829_v16  ;;  %v1285_v19 = vpop.f32.mrb[30].mxu1 }
 0x20c   : > { %v874_v20 = vmax.f32 %v838_v15, 0.0  ;;  %v841_v21 = vadd.f32 %v1285_v19, %v1751_v61  ;;  %v832_v57 = vpop.f32.mrb[31].mxu1 }
 0x20d   : > { %v872_v23 = vmax.f32 %v830_v18, 0.0  ;;  %v833_v24 = vadd.f32 %v1751_v61, %v832_v57  ;;  %1338 = vxpose.xlu0.b32.cont [6/16] %v1337_v48, 128  ;;  %v1523_v61 = vmov 0  }
 0x20e   : > { %v875_v25 = vmax.f32 %v841_v21, 0.0  ;;  %v1355_v26 = vpack.i.bf16 %v858_v59, %v874_v20  ;;  %989 = vmatprep.mubr.bf16.mxu0 %v1523_v61  ;;  %1439 = vset.pattern.permute.xlu1 %v1523_v61 }
 0x20f   : > { %v873_v28 = vmax.f32 %v833_v24, 0.0  ;;  %v1351_v29 = vpack.i.bf16 %v856_v22, %v872_v23  ;;  %1001 = vperm.xlu1 %1439, %v998_v31  }
 0x210   : > { %v1357_v60 = vpack.i.bf16 %v859_v58, %v875_v25 }
 0x211   : > { %1340 = vxpose.xlu0.b32.cont [7/16] %v1339_v40, 128  ;;  %v1353_v30 = vpack.i.bf16 %v857_v27, %v873_v28 }
 0x215   : > { %1342 = vxpose.xlu0.b32.cont [8/16] %v1341_v45, 128 }
 0x219   : > { %1344 = vxpose.xlu0.b32.cont [9/16] %v1343_v9, 128 }
 0x21d   : > { %1346 = vxpose.xlu0.b32.cont [10/16] %v1345_v13, 128 }
 0x221   : > { %1348 = vxpose.xlu0.b32.cont [11/16] %v1347_v6, 128 }
 0x225   : > { %1350 = vxpose.xlu0.b32.cont [12/16] %v1349_v10, 128 }
 0x229   : > { %1352 = vxpose.xlu0.b32.cont [13/16] %v1351_v29, 128 }
 0x22d   : > { %1354 = vxpose.xlu0.b32.cont [14/16] %v1353_v30, 128 }
 0x231   : > { %1356 = vxpose.xlu0.b32.cont [15/16] %v1355_v26, 128 }
 0x235   : > { %1358 = vxpose.xlu0.b32.end [16/16] %v1357_v60, 128 }
 0x25e   : > { %1440 = vset.pattern.permute.xlu0 %v1523_v61 }
 0x279   : > { %v1359_v32 = vpop.trf.xlu0 }
 0x27a   : > { %v1363_v33 = vunpack.i.h.bf16 %v1359_v32  ;;  %v1360_v34 = vunpack.i.l.bf16 %v1359_v32  ;;  %v956_v32 = vld [vmem:[%s1845_s5] sm:$0xf] }
 0x27d   : > { %v1364_v35 = vpop.trf.xlu0 }
 0x27e   : > { %v1368_v36 = vunpack.i.h.bf16 %v1364_v35  ;;  %v1365_v37 = vunpack.i.l.bf16 %v1364_v35 }
 0x280   : > { %v941_v38 = vpack.c.bf16 %v1365_v37, %v1360_v34  ;;  %v940_v39 = vpack.c.bf16 %v1368_v36, %v1363_v33  ;;  %v1004_v33 = vlaneseq }
 0x281   : > { %v1369_v40 = vpop.trf.xlu0 }
 0x282   : > { %957 = vmatprep.subr.bf16.mxu0 %v941_v38  ;;  %v1373_v41 = vunpack.i.h.bf16 %v1369_v40  ;;  %v1370_v42 = vunpack.i.l.bf16 %v1369_v40  ;;  %v1005_v34 = vshrl.u32 %v1004_v33, 7  ;;  %vm1042_vm1 = vcmp.lt.s32.totalorder %v1004_v33, 256 }
 0x283   : > { %958 = vmatpush1.bf16.msra.mxu0 %v940_v39 }
 0x284   : > { %v1006_v35 = vsub.s32 0, %v1005_v34 }
 0x285   : > { %v1374_v43 = vpop.trf.xlu0 }
 0x286   : > { %v1378_v44 = vunpack.i.h.bf16 %v1374_v43  ;;  %v1375_v45 = vunpack.i.l.bf16 %v1374_v43 }
 0x288   : > { %v943_v46 = vpack.c.bf16 %v1375_v45, %v1370_v42  ;;  %v942_v47 = vpack.c.bf16 %v1378_v44, %v1373_v41 }
 0x289   : > { %v1379_v48 = vpop.trf.xlu0 }
 0x28a   : > { %959 = vmatprep.subr.bf16.mxu0 %v943_v46  ;;  %v1383_v49 = vunpack.i.h.bf16 %v1379_v48  ;;  %v1380_v50 = vunpack.i.l.bf16 %v1379_v48 }
 0x28b   : > { %960 = vmatpush1.bf16.msra.mxu0 %v942_v47 }
 0x28d   : > { %v1384_v51 = vpop.trf.xlu0 }
 0x28e   : > { %v1388_v52 = vunpack.i.h.bf16 %v1384_v51  ;;  %v1385_v62 = vunpack.i.l.bf16 %v1384_v51  ;;  %v1002_v36 = vpop.permute.xlu1 %1001 }
 0x28f   : > { %v1007_v37 = vrot.slane %v1002_v36, %v1006_v35 }
 0x290   : > { %v945_v63 = vpack.c.bf16 %v1385_v62, %v1380_v50  ;;  %v944_v0 = vpack.c.bf16 %v1388_v52, %v1383_v49  ;;  %v1524_v52 = vmov 1966171168  }
 0x291   : > { %v1389_v1 = vpop.trf.xlu0  ;;  %v1026_v62 = vunpack.c.l.s4 %v1524_v52 }
 0x292   : > { %961 = vmatprep.subr.bf16.mxu0 %v945_v63  ;;  %v1393_v53 = vunpack.i.h.bf16 %v1389_v1  ;;  %v1390_v2 = vunpack.i.l.bf16 %v1389_v1 }
 0x293   : > { %962 = vmatpush1.bf16.msra.mxu0 %v944_v0  ;;  %v1027_v63 = vunpack.c.0.s8 %v1026_v62 }
 0x295   : > { %v1394_v54 = vpop.trf.xlu0  ;;  %v1030_v1 = vsub.s32 %v1027_v63, %v1005_v34 }
 0x296   : > { %v1398_v3 = vunpack.i.h.bf16 %v1394_v54  ;;  %v1395_v4 = vunpack.i.l.bf16 %v1394_v54 }
 0x298   : > { %v947_v55 = vpack.c.bf16 %v1395_v4, %v1390_v2  ;;  %v946_v5 = vpack.c.bf16 %v1398_v3, %v1393_v53 }
 0x299   : > { %v1399_v6 = vpop.trf.xlu0 }
 0x29a   : > { %963 = vmatprep.subr.bf16.mxu0 %v947_v55  ;;  %v1403_v7 = vunpack.i.h.bf16 %v1399_v6  ;;  %v1400_v8 = vunpack.i.l.bf16 %v1399_v6 }
 0x29b   : > { %964 = vmatpush1.bf16.msra.mxu0 %v946_v5 }
 0x29d   : > { %v1404_v9 = vpop.trf.xlu0 }
 0x29e   : > { %v1408_v56 = vunpack.i.h.bf16 %v1404_v9  ;;  %v1405_v10 = vunpack.i.l.bf16 %v1404_v9 }
 0x2a0   : > { %v949_v11 = vpack.c.bf16 %v1405_v10, %v1400_v8  ;;  %v948_v12 = vpack.c.bf16 %v1408_v56, %v1403_v7 }
 0x2a1   : > { %v1409_v13 = vpop.trf.xlu0 }
 0x2a2   : > { %965 = vmatprep.subr.bf16.mxu0 %v949_v11  ;;  %v1413_v14 = vunpack.i.h.bf16 %v1409_v13  ;;  %v1410_v15 = vunpack.i.l.bf16 %v1409_v13 }
 0x2a3   : > { %966 = vmatpush1.bf16.msra.mxu0 %v948_v12 }
 0x2a5   : > { %v1414_v16 = vpop.trf.xlu0 }
 0x2a6   : > { %v1418_v17 = vunpack.i.h.bf16 %v1414_v16  ;;  %v1415_v18 = vunpack.i.l.bf16 %v1414_v16 }
 0x2a8   : > { %v951_v19 = vpack.c.bf16 %v1415_v18, %v1410_v15  ;;  %v950_v59 = vpack.c.bf16 %v1418_v17, %v1413_v14 }
 0x2a9   : > { %v1419_v20 = vpop.trf.xlu0 }
 0x2aa   : > { %967 = vmatprep.subr.bf16.mxu0 %v951_v19  ;;  %v1423_v21 = vunpack.i.h.bf16 %v1419_v20  ;;  %v1420_v57 = vunpack.i.l.bf16 %v1419_v20 }
 0x2ab   : > { %968 = vmatpush1.bf16.msra.mxu0 %v950_v59 }
 0x2ad   : > { %v1424_v22 = vpop.trf.xlu0 }
 0x2ae   : > { %v1428_v23 = vunpack.i.h.bf16 %v1424_v22  ;;  %v1425_v24 = vunpack.i.l.bf16 %v1424_v22 }
 0x2b0   : > { %v953_v58 = vpack.c.bf16 %v1425_v24, %v1420_v57  ;;  %v952_v25 = vpack.c.bf16 %v1428_v23, %v1423_v21 }
 0x2b1   : > { %v1429_v26 = vpop.trf.xlu0 }
 0x2b2   : > { %969 = vmatprep.subr.bf16.mxu0 %v953_v58  ;;  %v1433_v27 = vunpack.i.h.bf16 %v1429_v26  ;;  %v1430_v28 = vunpack.i.l.bf16 %v1429_v26 }
 0x2b3   : > { %970 = vmatpush1.bf16.msra.mxu0 %v952_v25 }
 0x2b5   : > { %v1434_v29 = vpop.trf.xlu0 }
 0x2b6   : > { %v1438_v60 = vunpack.i.h.bf16 %v1434_v29  ;;  %v1435_v30 = vunpack.i.l.bf16 %v1434_v29 }
 0x2b8   : > { %v954_v61 = vpack.c.bf16 %v1438_v60, %v1433_v27  ;;  %v955_v31 = vpack.c.bf16 %v1435_v30, %v1430_v28 }
 0x2ba   : > { %971 = vmatprep.subr.bf16.mxu0 %v955_v31 }
 0x2bb   : > { %972 = vmatpush1.bf16.msra.mxu0 %v954_v61 }
 0x2be   : > { %990 = vmatmul.mubr.bf16.vlgmr.msra.gmra.mrb[32].mxu0 %v956_v32 }
 0x391   : > { %v991_v38 = vpop.f32.mrb[32].mxu0 }
 0x392   : > { %v1008_v39 = vadd.f32 %v1007_v37, %v991_v38  ;;  %v993_v40 = vpop.f32.mrb[33].mxu0 }
 0x393   : > { %v1009_v41 = vadd.f32 %v1007_v37, %v993_v40  ;;  %v995_v42 = vpop.f32.mrb[34].mxu0 }
 0x394   : > { %v1010_v43 = vsub.f32 0.0, %v1008_v39  ;;  %v996_v44 = vpop.f32.mrb[35].mxu0 }
 0x395   : > { %v1011_v45 = vsub.f32 0.0, %v1009_v41 }
 0x396   : > { %v1012_v46 = vmul.f32 1.442695, %v1010_v43 }
 0x397   : > { %v1014_v47 = vmul.f32 1.442695, %v1011_v45 }
 0x398   : > { %1451 = vpow2.f32 %v1012_v46 }
 0x399   : > { %1453 = vpow2.f32 %v1014_v47 }
 0x3a2   : > { %v1452_v48 = vpop.eup %1451 }
 0x3a3   : > { %v1454_v49 = vpop.eup %1453  ;;  %v1016_v50 = vadd.f32 1.0, %v1452_v48 }
 0x3a4   : > { %v1017_v51 = vadd.f32 1.0, %v1454_v49 }
 0x3a5   : > { %1455 = vrcp.f32 %v1016_v50 }
 0x3a6   : > { %1457 = vrcp.f32 %v1017_v51 }
 0x3af   : > { %v1456_v0 = vpop.eup %1455 }
 0x3b0   : > { %v1458_v53 = vpop.eup %1457 }
 0x3b1   : > { %v1024_v2 = vcombine.low %v1456_v0, %v1458_v53 }
 0x3b3   : > { %v1031_v54 = vrot.slane %v1024_v2, %v1030_v1 }
 0x3b5   : > { %v1038_v3 = vrot.slane %v1031_v54, %v1030_v1 }
 0x3b7   : > { %1044 = vst.msk [vmem:[%s274_s18] sm:$0x3] %vm1042_vm1, %v1038_v3 }
 0x3b8   : > { %1472 = shalt.err (!%p1469_p3)
}
 0x3b9   : > { %s1473_s16 = scalar_lea.hbm %s1798_s22, 32  ;;  %s1477_s14 = scalar_lea.hbm %s1847_s7, 64 }
 0x3ba   : > { %p1474_p4 = scmp.ne.s32.totalorder %s1798_s22, %s1473_s16  ;;  %p1478_p9 = scmp.lt.u32.totalorder %s1798_s22, %s1847_s7 }
 0x3bb   : > { %p1479_p10 = scmp.lt.u32.totalorder %s1477_s14, %s1473_s16  ;;  %p1481_p12 = scmp.lt.u32.totalorder %s1473_s16, %s1798_s22 }
 0x3bc   : > { %p1475_p7 = pnand %p1474_p4, %p1604_p5 }
 0x3bd   : > { %p1480_p11 = por %p1479_p10, %p1478_p9 }
 0x3be   : > { %p1476_p8 = pneg %p1475_p7 }
 0x3bf   : > { %p1482_p13 = por %p1481_p12, %p1480_p11 }
 0x3c1   : > { %p1483_p0 = pnand %p1482_p13, %p1476_p8 }
 0x3c3   : > { %1486 = shalt.err (!%p1483_p0)
}
 0x3c4   : > { %1286 = dma.vmem_to_hbm [thread:$0]  (%p1604_p5), %s1800_s19, 32, %s1798_s22, %s1046_s23  }
 0x3c5 PF: > { %p1292_p1 = scmp.ge.s32.totalorder %s1521_s29, 2  ;;  %s1072_s18 = sand.u32 1, %s1509_s26  }
 0x3c6   : > { %s1073_s20 = scalar_lea.sflag [#allocation4], %s1072_s18 }
 0x3c7   : > { %p1289_p2 = pnand %p1292_p1, %p1608_p6 }
 0x3c9   : > { %1504 = dma.done.wait (!%p1289_p2), %s1073_s20, 32  }
 0x3ca   : > { %1506 = vsyncadd (!%p1289_p2), %s1073_s20, 4294967264  ;;  %p19_p3 = scmp.ge.s32.totalorder %s1592_s8, 4   ;;  %s1850_s26 = smov %s1513_s27 }
 0x3cb   : > { %s1851_s27 = smov %s1517_s28  ;;  %s1852_s28 = smov %s1602_s11 }
 0x3cc   : > { %s1853_s29 = smov %s1592_s8  ;;  %21 = sbr.rel (!%p19_p3) target bundleno = 6 (0x6), region = 83 }
 0x3d3   :  { %1078 = vsyncpa [#allocation4], 1 }
 0x3d4   :  { %1080 = vsyncpa [#allocation4 + $0x1], 1 }

</bundles_post_ra>
